<compile_context>
chip_gen: v7x
topology: tpu7x:2x2x1
jax: 0.10.0
libtpu: 0.0.40
codegen_flags: <defaults>
</compile_context>

<pallas_src>
import functools

import jax
import jax.numpy as jnp
from jax.experimental import pallas as pl
from jax.experimental.pallas import tpu as pltpu


def _round_up(x, m):
    return (x + m - 1) // m * m


def _head_kernel(sem_ref, stru_ref, y_ref, ws_ref, wt_ref, b_ref,
                 probs_ref, psum_ref, *, n_rows, block_n):
    """One batch tile (feature-major): Linear(D,1) -> sigmoid -> masked BCE sum."""
    i = pl.program_id(0)

    xs = sem_ref[...].astype(jnp.float32)           # (d1, block_n)
    xt = stru_ref[...].astype(jnp.float32)          # (d2, block_n)
    ws = ws_ref[...].astype(jnp.float32)            # (d1, 1)
    wt = wt_ref[...].astype(jnp.float32)            # (d2, 1)
    b = b_ref[0, 0]                                 # scalar bias (SMEM)

    # Mat-vec as VPU multiplies + sublane (XLU) reduces; the logits are born
    # lane-dense (1, block_n) -- no relayout needed.  MXU deliberately not
    # used: K = D <= 128 and N_out = 1 would leave it ~1% utilized.
    logits = (jnp.sum(xs * ws, axis=0, keepdims=True)
              + jnp.sum(xt * wt, axis=0, keepdims=True) + b)      # (1, block_n)

    p = jax.nn.sigmoid(logits)                                    # (1, block_n)
    probs_ref[...] = p                                            # lane-dense store

    # BCELoss (PyTorch clamps the log terms at -100); mean taken in wrapper.
    y = y_ref[...].astype(jnp.float32)                            # (1, block_n)
    log_p = jnp.maximum(jnp.log(p), -100.0)
    log_1mp = jnp.maximum(jnp.log(1.0 - p), -100.0)
    bce = -(y * log_p + (1.0 - y) * log_1mp)                      # (1, block_n)

    # Ragged last tile: out-of-range columns (garbage reads) must not
    # contribute to the loss.  jnp.where selects, so NaNs do not propagate.
    col = jax.lax.broadcasted_iota(jnp.int32, (1, block_n), 1)
    valid = (i * block_n + col) < n_rows
    bce = jnp.where(valid, bce, 0.0)

    # Per-tile partial sum; lane-dense 512 B store per step keeps the grid
    # axis "parallel" (v7x: both TensorCores) and is reduced in the wrapper.
    psum_ref[...] = jnp.broadcast_to(jnp.sum(bce), (1, 1, 128)).astype(jnp.float32)


def baai_head(semantic_outputs, stru_outputs, w, b, labels, *, block_n=8192):
    """semantic_outputs: (N, D1), stru_outputs: (N, D2),
       w: (1, D1+D2) [nn.Linear(D1+D2, 1).weight], b: scalar, labels: (N,)."""
    n, d1 = semantic_outputs.shape
    d2 = stru_outputs.shape[1]
    d = d1 + d2
    assert w.shape == (1, d)

    # Feature-major layout, two separate inputs (no concatenated HBM copy).
    # Activations keep their native dtype (bf16 stays bf16 on the HBM stream).
    sem_t = semantic_outputs.T                      # (d1, N)
    stru_t = stru_outputs.T                         # (d2, N)
    y = labels.astype(jnp.float32).reshape(1, n)

    n_cols = n
    if n < 128:
        # Tiny batch: pad the lane axis up to one vreg row (negligible cost).
        n_cols = 128
        pad = n_cols - n
        sem_t = jnp.pad(sem_t, ((0, 0), (0, pad)))
        stru_t = jnp.pad(stru_t, ((0, 0), (0, pad)))
        y = jnp.pad(y, ((0, 0), (0, pad)))
        block_n = 128
    else:
        # No padding of the activations: the ragged last tile is masked in the
        # kernel.  block_n is a multiple of 128, never exceeds N, and is capped
        # so there are >= 2 grid steps (keeps both v7x TensorCores busy).
        block_n = max(block_n // 128, 1) * 128
        block_n = max(128, min(block_n,
                               (n // 128) * 128,
                               _round_up(-(-n // 2), 128)))

    num_blocks = -(-n_cols // block_n)

    w32 = w.astype(jnp.float32)
    w_sem = w32[:, :d1].T                           # (d1, 1)
    w_stru = w32[:, d1:].T                          # (d2, 1)
    b_smem = jnp.asarray(b, jnp.float32).reshape(1, 1)

    kernel = functools.partial(_head_kernel, n_rows=n, block_n=block_n)

    probs, psum = pl.pallas_call(
        kernel,
        grid=(num_blocks,),
        in_specs=[
            pl.BlockSpec((d1, block_n), lambda i: (0, i)),          # semantic tile
            pl.BlockSpec((d2, block_n), lambda i: (0, i)),          # structural tile
            pl.BlockSpec((1, block_n), lambda i: (0, i)),           # labels
            pl.BlockSpec((d1, 1), lambda i: (0, 0)),                # w (semantic part)
            pl.BlockSpec((d2, 1), lambda i: (0, 0)),                # w (structural part)
            pl.BlockSpec(memory_space=pltpu.MemorySpace.SMEM),      # bias
        ],
        out_specs=(
            pl.BlockSpec((1, block_n), lambda i: (0, i)),           # probs (lane-dense)
            pl.BlockSpec((1, 1, 128), lambda i: (i, 0, 0)),         # BCE partials
        ),
        out_shape=(
            jax.ShapeDtypeStruct((1, n_cols), jnp.float32),
            jax.ShapeDtypeStruct((num_blocks, 1, 128), jnp.float32),
        ),
        compiler_params=pltpu.CompilerParams(
            dimension_semantics=("parallel",),       # shard across v7x TCs
            vmem_limit_bytes=32 * 1024 * 1024,       # safe on v5e/v6e/v7x
        ),
    )(sem_t, stru_t, y, w_sem, w_stru, b_smem)

    outputs = probs[0, :n]                                   # .squeeze(1)
    loss_all = jnp.sum(psum[:, 0, 0]) / jnp.float32(n)       # BCE mean over true N
    # TODO(synk): loss_all + loss_rec (trans_decoder) and the optional
    #             0.5*loss + 0.5*p2p_loss mix need the external sub-models.
    return loss_all, outputs


def _reference(semantic_outputs, stru_outputs, w, b, labels):
    x = jnp.concatenate([semantic_outputs, stru_outputs], axis=1).astype(jnp.float32)
    logits = jnp.sum(x * w[0].astype(jnp.float32), axis=-1) + b
    p = jax.nn.sigmoid(logits)
    bce = -(labels * jnp.maximum(jnp.log(p), -100.0)
            + (1 - labels) * jnp.maximum(jnp.log(1 - p), -100.0))
    return jnp.mean(bce), p


if __name__ == "__main__":
    # Small shapes standing in for: latent_dim -> 32, GAT output (128) -> 16.
    N, D1, D2 = 8, 32, 16           # batch of edges, semantic dim, structural dim
    D = D1 + D2                     # final_out_dim (training_type=3 branch)

    key = jax.random.PRNGKey(0)
    k_sem, k_stru, k_w, k_b, k_y = jax.random.split(key, 5)

    semantic_outputs = jax.random.normal(k_sem, (N, D1), jnp.float32)
    stru_outputs = jax.random.normal(k_stru, (N, D2), jnp.float32)
    labels = (jax.random.uniform(k_y, (N,)) > 0.5).astype(jnp.float32)

    # nn.Linear(D, 1) deterministic init: U(-1/sqrt(D), 1/sqrt(D))
    bound = 1.0 / jnp.sqrt(jnp.float32(D))
    w = jax.random.uniform(k_w, (1, D), jnp.float32, -bound, bound)
    b = jax.random.uniform(k_b, (), jnp.float32, -bound, bound)

    loss_all, outputs = baai_head(semantic_outputs, stru_outputs, w, b, labels)
    jax.block_until_ready((loss_all, outputs))

    ref_loss, ref_out = _reference(semantic_outputs, stru_outputs, w, b, labels)
    assert outputs.shape == (N,)
    assert jnp.allclose(outputs, ref_out, atol=1e-5, rtol=1e-5)
    assert jnp.allclose(loss_all, ref_loss, atol=1e-5, rtol=1e-5)

    # Multi-tile + ragged-tail path: small block_n forces several grid steps
    # and a masked (un-padded) last tile.
    N2 = 300
    k2 = jax.random.split(key, 3)
    sem2 = jax.random.normal(k2[0], (N2, D1), jnp.float32)
    stru2 = jax.random.normal(k2[1], (N2, D2), jnp.float32)
    labels2 = (jax.random.uniform(k2[2], (N2,)) > 0.5).astype(jnp.float32)

    loss2, out2 = baai_head(sem2, stru2, w, b, labels2, block_n=128)
    jax.block_until_ready((loss2, out2))
    ref_loss2, ref_out2 = _reference(sem2, stru2, w, b, labels2)
    assert out2.shape == (N2,)
    assert jnp.allclose(out2, ref_out2, atol=1e-5, rtol=1e-5)
    assert jnp.allclose(loss2, ref_loss2, atol=1e-5, rtol=1e-5)

    # Default (large) block_n path + bf16 activations passed straight through
    # (halves the dominant HBM stream; compute is still f32 in-kernel).
    sem3 = sem2.astype(jnp.bfloat16)
    stru3 = stru2.astype(jnp.bfloat16)
    loss3, out3 = baai_head(sem3, stru3, w, b, labels2)
    jax.block_until_ready((loss3, out3))
    ref_loss3, ref_out3 = _reference(sem3.astype(jnp.float32),
                                     stru3.astype(jnp.float32), w, b, labels2)
    assert out3.shape == (N2,)
    assert jnp.allclose(out3, ref_out3, atol=1e-5, rtol=1e-5)
    assert jnp.allclose(loss3, ref_loss3, atol=1e-5, rtol=1e-5)

    print("KERNEL_OK")
</pallas_src>

<mosaic_0001>
module attributes {stable_mosaic.version = 11 : i64} {
  func.func @_head_kernel(%arg0: i32, %arg1: memref<32x128xf32, #tpu.memory_space<vmem>>, %arg2: memref<16x128xf32, #tpu.memory_space<vmem>>, %arg3: memref<1x128xf32, #tpu.memory_space<vmem>>, %arg4: memref<32x1xf32, #tpu.memory_space<vmem>>, %arg5: memref<16x1xf32, #tpu.memory_space<vmem>>, %arg6: memref<1x1xf32, #tpu.memory_space<smem>>, %arg7: memref<1x128xf32, #tpu.memory_space<vmem>>, %arg8: memref<1x1x128xf32, #tpu.memory_space<vmem>>) attributes {dimension_semantics = [#tpu.dimension_semantics<parallel>], iteration_bounds = array<i64: 1>, scalar_prefetch = 0 : i64, scratch_operands = 0 : i64, tpu.core_type = #tpu.core_type<tc>, window_params = [{transform_indices = @transform_0, window_bounds = array<i64: 32, 128>}, {transform_indices = @transform_1, window_bounds = array<i64: 16, 128>}, {transform_indices = @transform_2, window_bounds = array<i64: 1, 128>}, {pipeline_mode = #tpu.pipeline_mode<synchronous>, transform_indices = @transform_3, window_bounds = array<i64: 32, 1>}, {pipeline_mode = #tpu.pipeline_mode<synchronous>, transform_indices = @transform_4, window_bounds = array<i64: 16, 1>}, {transform_indices = @transform_5, window_bounds = array<i64: 1, 1>}, {transform_indices = @transform_6, window_bounds = array<i64: 1, 128>}, {transform_indices = @transform_7, window_bounds = array<i64: 1, 1, 128>}]} {
    %c0 = arith.constant 0 : index
    %c0_0 = arith.constant 0 : index
    %0 = vector.load %arg1[%c0, %c0_0] : memref<32x128xf32, #tpu.memory_space<vmem>>, vector<32x128xf32>
    %c0_1 = arith.constant 0 : index
    %c0_2 = arith.constant 0 : index
    %1 = vector.load %arg2[%c0_1, %c0_2] : memref<16x128xf32, #tpu.memory_space<vmem>>, vector<16x128xf32>
    %c0_3 = arith.constant 0 : index
    %c0_4 = arith.constant 0 : index
    %2 = vector.load %arg4[%c0_3, %c0_4] : memref<32x1xf32, #tpu.memory_space<vmem>>, vector<32x1xf32>
    %c0_5 = arith.constant 0 : index
    %c0_6 = arith.constant 0 : index
    %3 = vector.load %arg5[%c0_5, %c0_6] : memref<16x1xf32, #tpu.memory_space<vmem>>, vector<16x1xf32>
    %c0_7 = arith.constant 0 : index
    %c0_8 = arith.constant 0 : index
    %4 = memref.load %arg6[%c0_7, %c0_8] : memref<1x1xf32, #tpu.memory_space<smem>>
    %5 = vector.broadcast %2 : vector<32x1xf32> to vector<32x128xf32>
    %6 = arith.mulf %0, %5 : vector<32x128xf32>
    %cst = arith.constant dense<0.000000e+00> : vector<128xf32>
    %7 = vector.multi_reduction <add>, %6, %cst [0] : vector<32x128xf32> to vector<128xf32>
    %8 = vector.shape_cast %7 : vector<128xf32> to vector<1x128xf32>
    %9 = vector.broadcast %3 : vector<16x1xf32> to vector<16x128xf32>
    %10 = arith.mulf %1, %9 : vector<16x128xf32>
    %cst_9 = arith.constant dense<0.000000e+00> : vector<128xf32>
    %11 = vector.multi_reduction <add>, %10, %cst_9 [0] : vector<16x128xf32> to vector<128xf32>
    %12 = vector.shape_cast %11 : vector<128xf32> to vector<1x128xf32>
    %13 = arith.addf %8, %12 : vector<1x128xf32>
    %14 = vector.broadcast %4 : f32 to vector<1x128xf32>
    %15 = arith.addf %13, %14 : vector<1x128xf32>
    %16 = arith.negf %15 : vector<1x128xf32>
    %17 = math.exp %16 : vector<1x128xf32>
    %cst_10 = arith.constant 1.000000e+00 : f32
    %18 = vector.broadcast %cst_10 : f32 to vector<1x128xf32>
    %19 = arith.addf %18, %17 : vector<1x128xf32>
    %20 = arith.divf %18, %19 : vector<1x128xf32>
    %c0_11 = arith.constant 0 : index
    %c0_12 = arith.constant 0 : index
    %21 = vector.load %arg7[%c0_11, %c0_12] : memref<1x128xf32, #tpu.memory_space<vmem>>, vector<1x128xf32>
    tpu.vector_store %arg7[%c0_11, %c0_12], %20 {strides = array<i32>} : memref<1x128xf32, #tpu.memory_space<vmem>>, vector<1x128xf32>,
    %c0_13 = arith.constant 0 : index
    %c0_14 = arith.constant 0 : index
    %22 = vector.load %arg3[%c0_13, %c0_14] : memref<1x128xf32, #tpu.memory_space<vmem>>, vector<1x128xf32>
    %23 = math.log %20 : vector<1x128xf32>
    %cst_15 = arith.constant -1.000000e+02 : f32
    %24 = vector.broadcast %cst_15 : f32 to vector<1x128xf32>
    %25 = arith.maximumf %23, %24 : vector<1x128xf32>
    %cst_16 = arith.constant 1.000000e+00 : f32
    %26 = vector.broadcast %cst_16 : f32 to vector<1x128xf32>
    %27 = arith.subf %26, %20 : vector<1x128xf32>
    %28 = math.log %27 : vector<1x128xf32>
    %cst_17 = arith.constant -1.000000e+02 : f32
    %29 = vector.broadcast %cst_17 : f32 to vector<1x128xf32>
    %30 = arith.maximumf %28, %29 : vector<1x128xf32>
    %31 = arith.mulf %22, %25 : vector<1x128xf32>
    %cst_18 = arith.constant 1.000000e+00 : f32
    %32 = vector.broadcast %cst_18 : f32 to vector<1x128xf32>
    %33 = arith.subf %32, %22 : vector<1x128xf32>
    %34 = arith.mulf %33, %30 : vector<1x128xf32>
    %35 = arith.addf %31, %34 : vector<1x128xf32>
    %cst_19 = arith.constant 0.000000e+00 : f32
    %36 = vector.broadcast %cst_19 : f32 to vector<1x128xf32>
    %37 = arith.subf %36, %35 : vector<1x128xf32>
    %38 = tpu.iota {dimensions = array<i32: 1>} : vector<1x128xi32>
    %c128_i32 = arith.constant 128 : i32
    %39 = arith.muli %arg0, %c128_i32 : i32
    %40 = vector.broadcast %39 : i32 to vector<1x128xi32>
    %41 = arith.addi %40, %38 : vector<1x128xi32>
    %c8_i32 = arith.constant 8 : i32
    %42 = vector.broadcast %c8_i32 : i32 to vector<1x128xi32>
    %43 = arith.cmpi slt, %41, %42 : vector<1x128xi32>
    %cst_20 = arith.constant 0.000000e+00 : f32
    %44 = vector.broadcast %cst_20 : f32 to vector<1x128xf32>
    %45 = arith.select %43, %37, %44 : vector<1x128xi1>, vector<1x128xf32>
    %46 = vector.shape_cast %45 : vector<1x128xf32> to vector<1x1x128xf32>
    %cst_21 = arith.constant dense<0.000000e+00> : vector<1xf32>
    %47 = vector.multi_reduction <add>, %46, %cst_21 [1, 2] : vector<1x1x128xf32> to vector<1xf32>
    %48 = vector.shape_cast %47 : vector<1xf32> to vector<1x1x1xf32>
    %49 = vector.extract %48[0, 0, 0] : f32 from vector<1x1x1xf32>
    %50 = vector.broadcast %49 : f32 to vector<1x1x128xf32>
    %c0_22 = arith.constant 0 : index
    %c0_23 = arith.constant 0 : index
    %c0_24 = arith.constant 0 : index
    %51 = vector.load %arg8[%c0_22, %c0_23, %c0_24] : memref<1x1x128xf32, #tpu.memory_space<vmem>>, vector<1x1x128xf32>
    tpu.vector_store %arg8[%c0_22, %c0_23, %c0_24], %50 {strides = array<i32>} : memref<1x1x128xf32, #tpu.memory_space<vmem>>, vector<1x1x128xf32>,
    return
  }
  func.func @transform_0(%arg0: i32) -> (i32, i32) {
    %c0_i32 = arith.constant 0 : i32
    %c0_i32_0 = arith.constant 0 : i32
    return %c0_i32, %arg0 : i32, i32
  }
  func.func @transform_1(%arg0: i32) -> (i32, i32) {
    %c0_i32 = arith.constant 0 : i32
    %c0_i32_0 = arith.constant 0 : i32
    return %c0_i32, %arg0 : i32, i32
  }
  func.func @transform_2(%arg0: i32) -> (i32, i32) {
    %c0_i32 = arith.constant 0 : i32
    %c0_i32_0 = arith.constant 0 : i32
    return %c0_i32, %arg0 : i32, i32
  }
  func.func @transform_3(%arg0: i32) -> (i32, i32) {
    %c0_i32 = arith.constant 0 : i32
    %c0_i32_0 = arith.constant 0 : i32
    %c0_i32_1 = arith.constant 0 : i32
    return %c0_i32, %c0_i32_0 : i32, i32
  }
  func.func @transform_4(%arg0: i32) -> (i32, i32) {
    %c0_i32 = arith.constant 0 : i32
    %c0_i32_0 = arith.constant 0 : i32
    %c0_i32_1 = arith.constant 0 : i32
    return %c0_i32, %c0_i32_0 : i32, i32
  }
  func.func @transform_5(%arg0: i32) -> (i32, i32) {
    %c0_i32 = arith.constant 0 : i32
    %c0_i32_0 = arith.constant 0 : i32
    %c0_i32_1 = arith.constant 0 : i32
    return %c0_i32, %c0_i32_0 : i32, i32
  }
  func.func @transform_6(%arg0: i32) -> (i32, i32) {
    %c0_i32 = arith.constant 0 : i32
    %c0_i32_0 = arith.constant 0 : i32
    return %c0_i32, %arg0 : i32, i32
  }
  func.func @transform_7(%arg0: i32) -> (i32, i32, i32) {
    %c0_i32 = arith.constant 0 : i32
    %c0_i32_0 = arith.constant 0 : i32
    %c0_i32_1 = arith.constant 0 : i32
    return %arg0, %c0_i32, %c0_i32_0 : i32, i32, i32
  }
}

</mosaic_0001>

<bundles_post_ra>
// kernel: tpu_custom_call.1
= control target key start
LH: loop header
LB: loop body
LE: loop exit
PB: predicated region body
PF: predicated region fallthrough
CT: control target
= control target key end

     0   :  { %14 = vsyncpa [#allocation4], 0  ;;  %v228_v2 = vmov 0   ;;  %s337_s0 = inlined_call_operand.vmem [shape: f32[32,128], index: 0, kind: input, shape index: {}]   ;;  %s338_s1 = inlined_call_operand.vmem [shape: f32[16,128], index: 1, kind: input, shape index: {}]   ;;  %s339_s2 = inlined_call_operand.vmem [shape: f32[1,128], index: 2, kind: input, shape index: {}]   ;;  %s340_s3 = inlined_call_operand.vmem [shape: f32[32,1], index: 3, kind: input, shape index: {}]   ;;  %s341_s4 = inlined_call_operand.vmem [shape: f32[16,1], index: 4, kind: input, shape index: {}]   ;;  %s342_s5 = inlined_call_operand.<no memory space> [shape: f32[1,1], index: 5, kind: input, shape index: {}]   ;;  %s343_s6 = inlined_call_operand.hbm [shape: f32[1,128], index: 6, kind: output, shape index: {0}]   ;;  %s344_s7 = inlined_call_operand.hbm [shape: f32[1,1,128], index: 7, kind: output, shape index: {1}]  }
   0x1   :  { %v36_v0 = vld [vmem:[%s340_s3 + $0x10] sm:$0xff]  ;;  %v34_v1 = vld [vmem:[%s340_s3] sm:$0xff]  ;;  %171 = vset.pattern.permute.xlu1 %v228_v2  ;;  %170 = vset.pattern.permute.xlu0 %v228_v2 }
   0x2   :  { %53 = vperm.xlu1 %171, %v36_v0   ;;  %43 = vperm.xlu0 %170, %v34_v1  }
   0x3   :  { %15 = vsyncpa [#allocation6], 0  ;;  %v37_v3 = vld [vmem:[%s340_s3 + $0x18] sm:$0xff]  ;;  %v35_v4 = vld [vmem:[%s340_s3 + $0x8] sm:$0xff]  ;;  %v94_v41 = vstv %s342_s5  ;;  %v116_v53 = vlaneseq  ;;  %vm123_vm1 = vcmask 1040384   ;;  %s229_s5 = smov [#allocation3]  }
   0x4   :  { %v39_v5 = vld [vmem:[%s341_s4 + $0x8] sm:$0xff]  ;;  %v38_v6 = vld [vmem:[%s341_s4] sm:$0xff]  ;;  %v30_v11 = vld [vmem:[%s337_s0 + $0x10] sm:$0xff]  ;;  %s142_s25 = sshll.u32 %s229_s5, 4  ;;  %s143_s25 = int_to_ptr.vmem [resolvable:$true] %s142_s25 }
   0x5   :  { %v28_v9 = vld [vmem:[%s337_s0] sm:$0xff]  ;;  %v29_v10 = vld [vmem:[%s337_s0 + $0x8] sm:$0xff]  ;;  %v31_v16 = vld [vmem:[%s337_s0 + $0x18] sm:$0xff]  ;;  %v117_v58 = vand.u32 127, %v116_v53  ;;  %s184_s26 = scalar_lea.vmem %s143_s25, 32  ;;  %p185_p1 = scmp.lt.s32.totalorder %s143_s25, %s143_s25 }
   0x6   :  { %58 = vperm.xlu1 %171, %v37_v3   ;;  %48 = vperm.xlu0 %170, %v35_v4   ;;  %v33_v17 = vld [vmem:[%s338_s1 + $0x8] sm:$0xff]  ;;  %v32_v18 = vld [vmem:[%s338_s1] sm:$0xff] }
   0x7   :  { %v103_v50 = vld [vmem:[%s339_s2] sm:$0x1]  ;;  %vm121_vm0 = vcmp.lt.s32.totalorder %v117_v58, 8  ;;  %s180_s2 = scalar_lea.vmem %s143_s25, 16 }
   0x8   :  { %v112_v56 = vsub.f32 1.0, %v103_v50  ;;  %p181_p0 = scmp.ne.s32.totalorder %s143_s25, %s180_s2  ;;  %p186_p2 = scmp.lt.s32.totalorder %s184_s26, %s180_s2 }
   0xa   :  { %81 = vperm.xlu1 %171, %v39_v5   ;;  %76 = vperm.xlu0 %170, %v38_v6   ;;  %p187_p3 = por %p186_p2, %p185_p1 }
   0xc   :  { %p188_p4 = pnand %p187_p3, %p181_p0 }
  0x81   :  { %v54_v7 = vpop.permute.xlu1 %53  ;;  %v44_v8 = vpop.permute.xlu0 %43 }
  0x82   :  { %v61_v14 = vmul.f32 %v44_v8, %v28_v9  ;;  %v63_v19 = vmul.f32 %v54_v7, %v30_v11 }
  0x85   :  { %v59_v12 = vpop.permute.xlu1 %58  ;;  %v49_v13 = vpop.permute.xlu0 %48 }
  0x86   :  { %v62_v15 = vmul.f32 %v49_v13, %v29_v10  ;;  %v64_v23 = vmul.f32 %v59_v12, %v31_v16 }
  0x88   :  { %v65_v20 = vadd.f32 %v62_v15, %v61_v14 }
  0x89   :  { %v82_v21 = vpop.permute.xlu1 %81  ;;  %v77_v22 = vpop.permute.xlu0 %76 }
  0x8a   :  { %v66_v24 = vadd.f32 %v65_v20, %v63_v19  ;;  %v85_v25 = vmul.f32 %v82_v21, %v33_v17  ;;  %v84_v26 = vmul.f32 %v77_v22, %v32_v18 }
  0x8c   :  { %v67_v27 = vadd.f32 %v66_v24, %v64_v23  ;;  %v86_v28 = vadd.f32 %v85_v25, %v84_v26 }
  0x8e   :  { %v68_v29 = vrot.slane %v67_v27, 4  ;;  %v87_v30 = vrot.slane %v86_v28, 4 }
  0x90   :  { %v69_v31 = vadd.f32 %v68_v29, %v67_v27  ;;  %v88_v32 = vadd.f32 %v87_v30, %v86_v28 }
  0x92   :  { %v70_v33 = vrot.slane %v69_v31, 2  ;;  %v89_v34 = vrot.slane %v88_v32, 2 }
  0x94   :  { %v71_v35 = vadd.f32 %v70_v33, %v69_v31  ;;  %v90_v36 = vadd.f32 %v89_v34, %v88_v32 }
  0x96   :  { %v72_v37 = vrot.slane %v71_v35, 1  ;;  %v91_v38 = vrot.slane %v90_v36, 1 }
  0x98   :  { %v73_v39 = vadd.f32 %v72_v37, %v71_v35  ;;  %v92_v40 = vadd.f32 %v91_v38, %v90_v36 }
  0x9a   :  { %v93_v42 = vadd.f32 %v92_v40, %v73_v39 }
  0x9c   :  { %v95_v43 = vadd.f32 %v94_v41, %v93_v42 }
  0x9e   :  { %v164_v44 = vmul.f32 -1.442695, %v95_v43 }
  0xa0   :  { %172 = vpow2.f32 %v164_v44 }
  0xaa   :  { %v173_v45 = vpop.eup %172 }
  0xab   :  { %v99_v46 = vadd.f32 1.0, %v173_v45 }
  0xad   :  { %174 = vrcp.f32 %v99_v46 }
  0xb7   :  { %v175_v47 = vpop.eup %174 }
  0xb8   :  { %102 = vst [vmem:[#allocation3] sm:$0x1] %v175_v47  ;;  %176 = vlog2.f32 %v175_v47  ;;  %v107_v48 = vsub.f32 1.0, %v175_v47 }
  0xba   :  { %178 = vlog2.f32 %v107_v48 }
  0xc2   :  { %v177_v49 = vpop.eup %176 }
  0xc3   :  { %v105_v51 = vmul.f32 0.6931472, %v177_v49 }
  0xc4   :  { %v179_v52 = vpop.eup %178 }
  0xc5   :  { %v106_v54 = vmax.f32 %v105_v51, -100.0  ;;  %v109_v55 = vmul.f32 0.6931472, %v179_v52 }
  0xc7   :  { %v110_v57 = vmax.f32 %v109_v55, -100.0  ;;  %v111_v59 = vmul.f32 %v106_v54, %v103_v50 }
  0xc9   :  { %v113_v60 = vmul.f32 %v112_v56, %v110_v57 }
  0xcb   :  { %v114_v61 = vadd.f32 %v113_v60, %v111_v59 }
  0xcd   :  { %v115_v62 = vsub.f32 0.0, %v114_v61 }
  0xcf   :  { %v122_v63 = vsel %vm121_vm0, %v115_v62, 0.0 }
  0xd0   :  { %v124_v0 = vsel %vm123_vm1, %v122_v63, 0.0 }
  0xd1   :  { %125 = vadd.xlane.f32.xlu0 %v124_v0 }
  0xd2   :  { %191 = shalt.err (!%p188_p4)
}
  0xd3   :  { %s192_s29 = scalar_lea.hbm %s343_s6, 16 }
  0xd4   :  { %p193_p5 = scmp.ne.s32.totalorder %s343_s6, %s192_s29  ;;  %p196_p6 = scmp.lt.u32.totalorder %s192_s29, %s343_s6 }
  0xd6   :  { %p198_p7 = pnand %p196_p6, %p193_p5 }
  0xd8   :  { %201 = shalt.err (!%p198_p7)
}
  0xd9   :  { %145 = dma.vmem_to_hbm [thread:$0]  %s143_s25, 16, %s343_s6, [#allocation4]  }
  0xda   :  { %s230_s13 = smov [#allocation5]  }
  0xdb   :  { %s152_s14 = sshll.u32 %s230_s13, 4  ;;  %s153_s14 = int_to_ptr.vmem [resolvable:$true] %s152_s14 }
  0xdc   :  { %s202_s3 = scalar_lea.vmem %s153_s14, 16  ;;  %s206_s16 = scalar_lea.vmem %s153_s14, 32 }
  0xdd   :  { %p203_p8 = scmp.ne.s32.totalorder %s153_s14, %s202_s3  ;;  %p207_p9 = scmp.lt.s32.totalorder %s153_s14, %s153_s14 }
  0xde   :  { %p208_p10 = scmp.lt.s32.totalorder %s206_s16, %s202_s3 }
  0xe0   :  { %p209_p11 = por %p208_p10, %p207_p9 }
  0xe2   :  { %p210_p12 = pnand %p209_p11, %p203_p8 }
 0x15e   :  { %v126_v1 = vpop.xlane.xlu0 %125 }
 0x15f   :  { %v127_v2 = vrot.slane %v126_v1, 4 }
 0x161   :  { %v128_v3 = vadd.f32 %v127_v2, %v126_v1 }
 0x163   :  { %v129_v4 = vrot.slane %v128_v3, 2 }
 0x165   :  { %v130_v5 = vadd.f32 %v129_v4, %v128_v3 }
 0x167   :  { %v131_v6 = vrot.slane %v130_v5, 1 }
 0x169   :  { %v132_v7 = vadd.f32 %v131_v6, %v130_v5 }
 0x16b   :  { %165 = vpush %v132_v7 }
 0x19c   :  { %s166_s15 = spop %165 }
 0x19d   :  { %v134_v8 = vstv %s166_s15 }
 0x19e   :  { %135 = vst [vmem:[#allocation5] sm:$0x1] %v134_v8 }
 0x19f   :  { %213 = shalt.err (!%p210_p12)
}
 0x1a0   :  { %s214_s4 = scalar_lea.hbm %s344_s7, 16 }
 0x1a1   :  { %p215_p13 = scmp.ne.s32.totalorder %s344_s7, %s214_s4  ;;  %p218_p0 = scmp.lt.u32.totalorder %s214_s4, %s344_s7 }
 0x1a3   :  { %p220_p1 = pnand %p218_p0, %p215_p13 }
 0x1a5   :  { %223 = shalt.err (!%p220_p1)
}
 0x1a6   :  { %155 = dma.vmem_to_hbm [thread:$0]  %s153_s14, 16, %s344_s7, [#allocation6]  }
 0x1a7   :  { %224 = dma.done.wait [#allocation4], 16  }
 0x1a8   :  { %225 = vsyncadd [#allocation4], 4294967280 }
 0x1a9   :  { %226 = dma.done.wait [#allocation6], 16  }
 0x1aa   :  { %227 = vsyncadd [#allocation6], 4294967280 }
 0x1ab   :  { %162 = vsyncpa [#allocation4], 1 }
 0x1ac   :  { %163 = vsyncpa [#allocation6], 1 }

</bundles_post_ra>
